<compile_context>
chip_gen: v7x
topology: tpu7x:2x2x1
jax: 0.10.0
libtpu: 0.0.40
codegen_flags: <defaults>
</compile_context>

<pallas_src>
import functools

import jax
import jax.numpy as jnp
import numpy as np
from jax import lax
from jax.experimental import pallas as pl
from jax.experimental.pallas import tpu as pltpu

EPS = 1e-5


# ----------------------------------------------------------------------------
# Fused adaLIN kernel: single-pass stats + one per-channel FMA apply.
#   x_ref     : (Bt, Cp, HW)   input block (native dtype)
#   gamma_ref : (Bt, Cp, 1)    precomputed soft gamma (f32)
#   beta_ref  : (Bt, Cp, 1)    precomputed soft beta  (f32)
#   rho_ref   : (Cp, 1)        rho parameter          (f32)
#   out_ref   : (Bt, Cp, HW)
# c_real / hw are compile-time Python ints (true channel count / spatial size).
# ----------------------------------------------------------------------------
def _adalin_kernel(x_ref, gamma_ref, beta_ref, rho_ref, out_ref, *, c_real, hw):
    x = x_ref[...]
    xf = x.astype(jnp.float32)                        # no-op for f32 inputs

    # Single-pass per-channel sums (lane reduce).
    s1 = jnp.sum(xf, axis=-1, keepdims=True)          # (Bt, Cp, 1)
    s2 = jnp.sum(xf * xf, axis=-1, keepdims=True)     # (Bt, Cp, 1)

    # Instance-norm statistics (unbiased, matches torch.var).
    in_mean = s1 * (1.0 / hw)
    in_var = jnp.maximum((s2 - s1 * in_mean) * (1.0 / (hw - 1)), 0.0)

    # Layer-norm statistics from the per-channel sums (padded channels are
    # zero so they contribute nothing; divide by the true C).
    t1 = jnp.sum(s1, axis=1, keepdims=True)           # (Bt, 1, 1)
    t2 = jnp.sum(s2, axis=1, keepdims=True)
    n_ln = c_real * hw
    ln_mean = t1 * (1.0 / n_ln)
    ln_var = jnp.maximum((t2 - t1 * ln_mean) * (1.0 / (n_ln - 1)), 0.0)

    inv_in = lax.rsqrt(in_var + EPS)                  # (Bt, Cp, 1)   (EUP)
    inv_ln = lax.rsqrt(ln_var + EPS)                  # (Bt, 1, 1)

    # Fold everything into out = a * x + b with per-(row, channel) a, b.
    rho = rho_ref[...]                                # (Cp, 1)
    gamma = gamma_ref[...]                            # (Bt, Cp, 1)
    beta = beta_ref[...]
    k_in = rho * inv_in                               # (Bt, Cp, 1)
    k_ln = (1.0 - rho) * inv_ln                       # (Bt, Cp, 1)
    a = gamma * (k_in + k_ln)
    b = beta - gamma * (k_in * in_mean + k_ln * ln_mean)

    out_ref[...] = (a * xf + b).astype(out_ref.dtype)


# ----------------------------------------------------------------------------
# Wrapper
# ----------------------------------------------------------------------------
def soft_adalin(x, content_features, style_features, params):
    B, C, H, W = x.shape
    HW = H * W
    f32 = jnp.float32

    # ---- soft gamma / beta, hoisted to XLA as batched (B,C)@(C,C) matmuls ---
    c = content_features.astype(f32)
    s = style_features.astype(f32)

    def mlp(z, w1, b1, w2, b2):
        h = jnp.maximum(z @ w1.astype(f32) + b1.astype(f32), 0.0)
        return h @ w2.astype(f32) + b2.astype(f32)

    cg = mlp(c, params["wc1g"], params["bc1g"], params["wc2g"], params["bc2g"])
    cb = mlp(c, params["wc1b"], params["bc1b"], params["wc2b"], params["bc2b"])
    sg = s @ params["wsg"].astype(f32) + params["bsg"].astype(f32)
    sb = s @ params["wsb"].astype(f32) + params["bsb"].astype(f32)
    wg = params["w_gamma"].astype(f32)
    wb = params["w_beta"].astype(f32)
    gamma = (1.0 - wg) * sg + wg * cg                 # (B, C)
    beta = (1.0 - wb) * sb + wb * cb                  # (B, C)

    # ---- pad channels to a multiple of 8 (full sublanes) --------------------
    Cp = ((C + 7) // 8) * 8
    pad_c = Cp - C
    xr = x.reshape(B, C, HW)
    if pad_c:
        xr = jnp.pad(xr, ((0, 0), (0, pad_c), (0, 0)))
        gamma = jnp.pad(gamma, ((0, 0), (0, pad_c)))
        beta = jnp.pad(beta, ((0, 0), (0, pad_c)))
    gamma_col = gamma.reshape(B, Cp, 1)
    beta_col = beta.reshape(B, Cp, 1)
    rho_col = params["rho"].astype(f32).reshape(C, 1)
    if pad_c:
        rho_col = jnp.pad(rho_col, ((0, pad_c), (0, 0)))

    # ---- VMEM budgeting & batch-rows-per-step (Bt) selection ----------------
    try:
        info = pltpu.get_tpu_info()
        vmem_cap = int(getattr(info, "vmem_capacity_bytes", 128 << 20))
    except Exception:
        vmem_cap = 128 << 20
    vmem_budget = int(vmem_cap * 0.75)                # leave compiler headroom

    def footprint(bt):
        blk = bt * Cp * HW
        in_out = 4 * blk * x.dtype.itemsize           # in + out, double-buffered
        temps = 3 * blk * 4                           # f32 copy, x*x, a*x+b
        return in_out + temps + (2 << 20)             # columns + slack

    Bt = 1
    for d in range(B, 0, -1):                         # largest divisor that fits
        if B % d == 0 and footprint(d) <= vmem_budget:
            Bt = d
            break
    # TODO(synk): if footprint(1) > vmem_budget (huge C*HW on v7x), tile HW.

    est_vmem = footprint(Bt)
    vmem_limit = int(min(vmem_budget, max(est_vmem, 32 << 20)))

    grid = (B // Bt,)
    kernel = functools.partial(_adalin_kernel, c_real=C, hw=HW)

    out = pl.pallas_call(
        kernel,
        out_shape=jax.ShapeDtypeStruct((B, Cp, HW), x.dtype),
        grid=grid,
        in_specs=[
            pl.BlockSpec((Bt, Cp, HW), lambda i: (i, 0, 0)),   # x
            pl.BlockSpec((Bt, Cp, 1), lambda i: (i, 0, 0)),    # gamma
            pl.BlockSpec((Bt, Cp, 1), lambda i: (i, 0, 0)),    # beta
            pl.BlockSpec((Cp, 1), lambda i: (0, 0)),           # rho (constant)
        ],
        out_specs=pl.BlockSpec((Bt, Cp, HW), lambda i: (i, 0, 0)),
        compiler_params=pltpu.CompilerParams(
            dimension_semantics=("parallel",),
            vmem_limit_bytes=vmem_limit,
        ),
    )(xr, gamma_col, beta_col, rho_col)

    return out[:, :C, :].reshape(B, C, H, W)


# ----------------------------------------------------------------------------
# Pure-JAX reference (mirrors the PyTorch forward exactly; two-pass variance)
# ----------------------------------------------------------------------------
def reference(x, content, style, p):
    def mlp(z, w1, b1, w2, b2):
        return jnp.maximum(z @ w1 + b1, 0.0) @ w2 + b2

    cg = mlp(content, p["wc1g"], p["bc1g"], p["wc2g"], p["bc2g"])
    cb = mlp(content, p["wc1b"], p["bc1b"], p["wc2b"], p["bc2b"])
    sg = style @ p["wsg"] + p["bsg"]
    sb = style @ p["wsb"] + p["bsb"]
    wg, wb = p["w_gamma"], p["w_beta"]
    gamma = (1.0 - wg) * sg + wg * cg
    beta = (1.0 - wb) * sb + wb * cb

    B, C, H, W = x.shape
    in_mean = jnp.mean(x, axis=(2, 3), keepdims=True)
    in_var = jnp.sum((x - in_mean) ** 2, axis=(2, 3), keepdims=True) / (H * W - 1)
    out_in = (x - in_mean) / jnp.sqrt(in_var + EPS)
    ln_mean = jnp.mean(x, axis=(1, 2, 3), keepdims=True)
    ln_var = jnp.sum((x - ln_mean) ** 2, axis=(1, 2, 3), keepdims=True) / (C * H * W - 1)
    out_ln = (x - ln_mean) / jnp.sqrt(ln_var + EPS)
    rho = p["rho"].reshape(1, C, 1, 1)
    out = rho * out_in + (1.0 - rho) * out_ln
    return out * gamma[:, :, None, None] + beta[:, :, None, None]


# ----------------------------------------------------------------------------
if __name__ == "__main__":
    B, C, H, W = 2, 4, 16, 16
    key = jax.random.PRNGKey(0)
    ks = jax.random.split(key, 16)

    def w(k):
        return (0.1 * jax.random.normal(k, (C, C))).astype(jnp.float32)

    def bvec(k):
        return (0.05 * jax.random.normal(k, (1, C))).astype(jnp.float32)

    params = {
        # content gamma MLP
        "wc1g": w(ks[0]), "bc1g": bvec(ks[1]), "wc2g": w(ks[2]), "bc2g": bvec(ks[3]),
        # content beta MLP
        "wc1b": w(ks[4]), "bc1b": bvec(ks[5]), "wc2b": w(ks[6]), "bc2b": bvec(ks[7]),
        # style gamma / beta linears
        "wsg": w(ks[8]), "bsg": bvec(ks[9]),
        "wsb": w(ks[10]), "bsb": bvec(ks[11]),
        # module __init__ values
        "w_gamma": jnp.zeros((1, C), jnp.float32),
        "w_beta": jnp.zeros((1, C), jnp.float32),
        "rho": jnp.full((1, C), 0.9, jnp.float32),
    }

    x = jax.random.normal(ks[12], (B, C, H, W), dtype=jnp.float32)
    content_features = jax.random.normal(ks[13], (B, C), dtype=jnp.float32)
    style_features = jax.random.normal(ks[14], (B, C), dtype=jnp.float32)

    out = soft_adalin(x, content_features, style_features, params)
    out = jax.block_until_ready(out)

    ref = reference(x, content_features, style_features, params)
    assert out.shape == (B, C, H, W)
    assert np.allclose(np.asarray(out), np.asarray(ref), atol=1e-4, rtol=1e-4), \
        "Pallas output does not match reference"

    print("KERNEL_OK")
</pallas_src>

<mosaic_0001>
module attributes {stable_mosaic.version = 11 : i64} {
  func.func @_adalin_kernel(%arg0: i32, %arg1: memref<2x8x256xf32, #tpu.memory_space<vmem>>, %arg2: memref<2x8x1xf32, #tpu.memory_space<vmem>>, %arg3: memref<2x8x1xf32, #tpu.memory_space<vmem>>, %arg4: memref<8x1xf32, #tpu.memory_space<vmem>>, %arg5: memref<2x8x256xf32, #tpu.memory_space<vmem>>) attributes {dimension_semantics = [#tpu.dimension_semantics<parallel>], iteration_bounds = array<i64: 1>, scalar_prefetch = 0 : i64, scratch_operands = 0 : i64, tpu.core_type = #tpu.core_type<tc>, window_params = [{transform_indices = @transform_0, window_bounds = array<i64: 2, 8, 256>}, {transform_indices = @transform_1, window_bounds = array<i64: 2, 8, 1>}, {transform_indices = @transform_2, window_bounds = array<i64: 2, 8, 1>}, {pipeline_mode = #tpu.pipeline_mode<synchronous>, transform_indices = @transform_3, window_bounds = array<i64: 8, 1>}, {transform_indices = @transform_4, window_bounds = array<i64: 2, 8, 256>}]} {
    %c0 = arith.constant 0 : index
    %c0_0 = arith.constant 0 : index
    %c0_1 = arith.constant 0 : index
    %0 = vector.load %arg1[%c0, %c0_0, %c0_1] : memref<2x8x256xf32, #tpu.memory_space<vmem>>, vector<2x8x256xf32>
    %cst = arith.constant dense<0.000000e+00> : vector<2x8xf32>
    %1 = vector.multi_reduction <add>, %0, %cst [2] : vector<2x8x256xf32> to vector<2x8xf32>
    %2 = vector.shape_cast %1 : vector<2x8xf32> to vector<2x8x1xf32>
    %3 = arith.mulf %0, %0 : vector<2x8x256xf32>
    %cst_2 = arith.constant dense<0.000000e+00> : vector<2x8xf32>
    %4 = vector.multi_reduction <add>, %3, %cst_2 [2] : vector<2x8x256xf32> to vector<2x8xf32>
    %5 = vector.shape_cast %4 : vector<2x8xf32> to vector<2x8x1xf32>
    %cst_3 = arith.constant 3.906250e-03 : f32
    %6 = vector.broadcast %cst_3 : f32 to vector<2x8x1xf32>
    %7 = arith.mulf %2, %6 : vector<2x8x1xf32>
    %8 = arith.mulf %2, %7 : vector<2x8x1xf32>
    %9 = arith.subf %5, %8 : vector<2x8x1xf32>
    %cst_4 = arith.constant 0.00392156886 : f32
    %10 = vector.broadcast %cst_4 : f32 to vector<2x8x1xf32>
    %11 = arith.mulf %9, %10 : vector<2x8x1xf32>
    %cst_5 = arith.constant 0.000000e+00 : f32
    %12 = vector.broadcast %cst_5 : f32 to vector<2x8x1xf32>
    %13 = arith.maximumf %11, %12 : vector<2x8x1xf32>
    %cst_6 = arith.constant dense<0.000000e+00> : vector<2x1xf32>
    %14 = vector.multi_reduction <add>, %2, %cst_6 [1] : vector<2x8x1xf32> to vector<2x1xf32>
    %15 = vector.shape_cast %14 : vector<2x1xf32> to vector<2x1x1xf32>
    %cst_7 = arith.constant dense<0.000000e+00> : vector<2x1xf32>
    %16 = vector.multi_reduction <add>, %5, %cst_7 [1] : vector<2x8x1xf32> to vector<2x1xf32>
    %17 = vector.shape_cast %16 : vector<2x1xf32> to vector<2x1x1xf32>
    %cst_8 = arith.constant 9.765625E-4 : f32
    %18 = vector.broadcast %cst_8 : f32 to vector<2x1x1xf32>
    %19 = arith.mulf %15, %18 : vector<2x1x1xf32>
    %20 = arith.mulf %15, %19 : vector<2x1x1xf32>
    %21 = arith.subf %17, %20 : vector<2x1x1xf32>
    %cst_9 = arith.constant 9.77517105E-4 : f32
    %22 = vector.broadcast %cst_9 : f32 to vector<2x1x1xf32>
    %23 = arith.mulf %21, %22 : vector<2x1x1xf32>
    %cst_10 = arith.constant 0.000000e+00 : f32
    %24 = vector.broadcast %cst_10 : f32 to vector<2x1x1xf32>
    %25 = arith.maximumf %23, %24 : vector<2x1x1xf32>
    %cst_11 = arith.constant 9.99999974E-6 : f32
    %26 = vector.broadcast %cst_11 : f32 to vector<2x8x1xf32>
    %27 = arith.addf %13, %26 : vector<2x8x1xf32>
    %28 = math.rsqrt %27 : vector<2x8x1xf32>
    %cst_12 = arith.constant 9.99999974E-6 : f32
    %29 = vector.broadcast %cst_12 : f32 to vector<2x1x1xf32>
    %30 = arith.addf %25, %29 : vector<2x1x1xf32>
    %31 = math.rsqrt %30 : vector<2x1x1xf32>
    %c0_13 = arith.constant 0 : index
    %c0_14 = arith.constant 0 : index
    %32 = vector.load %arg4[%c0_13, %c0_14] : memref<8x1xf32, #tpu.memory_space<vmem>>, vector<8x1xf32>
    %c0_15 = arith.constant 0 : index
    %c0_16 = arith.constant 0 : index
    %c0_17 = arith.constant 0 : index
    %33 = vector.load %arg2[%c0_15, %c0_16, %c0_17] : memref<2x8x1xf32, #tpu.memory_space<vmem>>, vector<2x8x1xf32>
    %c0_18 = arith.constant 0 : index
    %c0_19 = arith.constant 0 : index
    %c0_20 = arith.constant 0 : index
    %34 = vector.load %arg3[%c0_18, %c0_19, %c0_20] : memref<2x8x1xf32, #tpu.memory_space<vmem>>, vector<2x8x1xf32>
    %35 = vector.shape_cast %32 : vector<8x1xf32> to vector<1x8x1xf32>
    %36 = vector.broadcast %35 : vector<1x8x1xf32> to vector<2x8x1xf32>
    %37 = arith.mulf %36, %28 : vector<2x8x1xf32>
    %cst_21 = arith.constant 1.000000e+00 : f32
    %38 = vector.broadcast %cst_21 : f32 to vector<8x1xf32>
    %39 = arith.subf %38, %32 : vector<8x1xf32>
    %40 = vector.shape_cast %39 : vector<8x1xf32> to vector<1x8x1xf32>
    %41 = vector.broadcast %40 : vector<1x8x1xf32> to vector<2x8x1xf32>
    %42 = vector.broadcast %31 : vector<2x1x1xf32> to vector<2x8x1xf32>
    %43 = arith.mulf %41, %42 : vector<2x8x1xf32>
    %44 = arith.addf %37, %43 : vector<2x8x1xf32>
    %45 = arith.mulf %33, %44 : vector<2x8x1xf32>
    %46 = arith.mulf %37, %7 : vector<2x8x1xf32>
    %47 = vector.broadcast %19 : vector<2x1x1xf32> to vector<2x8x1xf32>
    %48 = arith.mulf %43, %47 : vector<2x8x1xf32>
    %49 = arith.addf %46, %48 : vector<2x8x1xf32>
    %50 = arith.mulf %33, %49 : vector<2x8x1xf32>
    %51 = arith.subf %34, %50 : vector<2x8x1xf32>
    %52 = vector.broadcast %45 : vector<2x8x1xf32> to vector<2x8x256xf32>
    %53 = arith.mulf %52, %0 : vector<2x8x256xf32>
    %54 = vector.broadcast %51 : vector<2x8x1xf32> to vector<2x8x256xf32>
    %55 = arith.addf %53, %54 : vector<2x8x256xf32>
    %c0_22 = arith.constant 0 : index
    %c0_23 = arith.constant 0 : index
    %c0_24 = arith.constant 0 : index
    %56 = vector.load %arg5[%c0_22, %c0_23, %c0_24] : memref<2x8x256xf32, #tpu.memory_space<vmem>>, vector<2x8x256xf32>
    tpu.vector_store %arg5[%c0_22, %c0_23, %c0_24], %55 {strides = array<i32>} : memref<2x8x256xf32, #tpu.memory_space<vmem>>, vector<2x8x256xf32>,
    return
  }
  func.func @transform_0(%arg0: i32) -> (i32, i32, i32) {
    %c0_i32 = arith.constant 0 : i32
    %c0_i32_0 = arith.constant 0 : i32
    %c0_i32_1 = arith.constant 0 : i32
    return %arg0, %c0_i32, %c0_i32_0 : i32, i32, i32
  }
  func.func @transform_1(%arg0: i32) -> (i32, i32, i32) {
    %c0_i32 = arith.constant 0 : i32
    %c0_i32_0 = arith.constant 0 : i32
    %c0_i32_1 = arith.constant 0 : i32
    return %arg0, %c0_i32, %c0_i32_0 : i32, i32, i32
  }
  func.func @transform_2(%arg0: i32) -> (i32, i32, i32) {
    %c0_i32 = arith.constant 0 : i32
    %c0_i32_0 = arith.constant 0 : i32
    %c0_i32_1 = arith.constant 0 : i32
    return %arg0, %c0_i32, %c0_i32_0 : i32, i32, i32
  }
  func.func @transform_3(%arg0: i32) -> (i32, i32) {
    %c0_i32 = arith.constant 0 : i32
    %c0_i32_0 = arith.constant 0 : i32
    %c0_i32_1 = arith.constant 0 : i32
    return %c0_i32, %c0_i32_0 : i32, i32
  }
  func.func @transform_4(%arg0: i32) -> (i32, i32, i32) {
    %c0_i32 = arith.constant 0 : i32
    %c0_i32_0 = arith.constant 0 : i32
    %c0_i32_1 = arith.constant 0 : i32
    return %arg0, %c0_i32, %c0_i32_0 : i32, i32, i32
  }
}

</mosaic_0001>

<bundles_post_ra>
// kernel: tpu_custom_call.1
= control target key start
LH: loop header
LB: loop body
LE: loop exit
PB: predicated region body
PF: predicated region fallthrough
CT: control target
= control target key end

     0   :  { %s300_s0 = inlined_call_operand.vmem [shape: f32[2,8,256], index: 0, kind: input, shape index: {}]   ;;  %s301_s1 = inlined_call_operand.vmem [shape: f32[2,8,1], index: 1, kind: input, shape index: {}]   ;;  %s302_s2 = inlined_call_operand.vmem [shape: f32[2,8,1], index: 2, kind: input, shape index: {}]   ;;  %s303_s3 = inlined_call_operand.vmem [shape: f32[8,1], index: 3, kind: input, shape index: {}]   ;;  %s304_s4 = inlined_call_operand.hbm [shape: f32[2,8,256], index: 4, kind: output, shape index: {}]  }
   0x1   :  { %v232_v0 = vld [vmem:[%s300_s0] sm:$0xff]  ;;  %v237_v1 = vld [vmem:[%s300_s0 + $0x8] sm:$0xff]  ;;  %v242_v2 = vld [vmem:[%s300_s0 + $0x10] sm:$0xff] }
   0x2   :  { %v22_v3 = vadd.f32 %v237_v1, %v232_v0  ;;  %v28_v4 = vmul.f32 %v232_v0, %v232_v0  ;;  %v29_v5 = vmul.f32 %v237_v1, %v237_v1  ;;  %v253_v6 = vld [vmem:[%s300_s0 + $0x18] sm:$0xff]  ;;  %v30_v7 = vmul.f32 %v242_v2, %v242_v2 }
   0x3   :  { %9 = vsyncpa [#allocation3], 0  ;;  %v31_v8 = vmul.f32 %v253_v6, %v253_v6  ;;  %v25_v10 = vadd.f32 %v253_v6, %v242_v2  ;;  %v200_v12 = vmov 0  }
   0x4   :  { %23 = vadd.xlane.f32.xlu0 %v22_v3  ;;  %v32_v9 = vadd.f32 %v29_v5, %v28_v4  ;;  %167 = vset.pattern.permute.xlu1 %v200_v12  ;;  %v90_v4 = vld [vmem:[%s303_s3] sm:$0xff] }
   0x5   :  { %v35_v11 = vadd.f32 %v31_v8, %v30_v7  ;;  %166 = vset.pattern.permute.xlu0 %v200_v12  ;;  %v97_v7 = vsub.f32 1.0, %v90_v4  ;;  %v91_v12 = vld [vmem:[%s301_s1] sm:$0xff] }
   0x6   :  { %33 = vadd.xlane.f32.xlu1 %v32_v9 }
   0x8   :  { %26 = vadd.xlane.f32.xlu0 %v25_v10 }
   0xa   :  { %36 = vadd.xlane.f32.xlu1 %v35_v11 }
  0x91   :  { %v24_v13 = vpop.xlane.xlu0 %23 }
  0x92   :  { %v261_v14 = vmul.f32 0.00390625, %v24_v13  ;;  %v48_v15 = vrot.slane %v24_v13, 4 }
  0x93   :  { %v34_v16 = vpop.xlane.xlu1 %33 }
  0x94   :  { %v49_v17 = vadd.f32 %v48_v15, %v24_v13  ;;  %v40_v18 = vmul.f32 %v261_v14, %v24_v13  ;;  %v60_v19 = vrot.slane %v34_v16, 4 }
  0x95   :  { %v27_v20 = vpop.xlane.xlu0 %26 }
  0x96   :  { %v50_v21 = vrot.slane %v49_v17, 2  ;;  %v61_v22 = vadd.f32 %v60_v19, %v34_v16  ;;  %v264_v23 = vmul.f32 0.00390625, %v27_v20  ;;  %v42_v24 = vsub.f32 %v34_v16, %v40_v18 }
  0x97   :  { %v54_v25 = vrot.slane %v27_v20, 4  ;;  %v37_v26 = vpop.xlane.xlu1 %36 }
  0x98   :  { %v51_v27 = vadd.f32 %v50_v21, %v49_v17  ;;  %v62_v28 = vrot.slane %v61_v22, 2  ;;  %v41_v29 = vmul.f32 %v264_v23, %v27_v20  ;;  %v66_v31 = vrot.slane %v37_v26, 4 }
  0x99   :  { %v55_v30 = vadd.f32 %v54_v25, %v27_v20  ;;  %v44_v34 = vmul.f32 0.003921569, %v42_v24 }
  0x9a   :  { %v52_v32 = vrot.slane %v51_v27, 1  ;;  %v63_v33 = vadd.f32 %v62_v28, %v61_v22  ;;  %v43_v36 = vsub.f32 %v37_v26, %v41_v29  ;;  %v67_v37 = vadd.f32 %v66_v31, %v37_v26  ;;  %v92_v22 = vld [vmem:[%s301_s1 + $0x8] sm:$0xff]  ;;  %s201_s1 = smov [#allocation2]  }
  0x9b   :  { %v56_v35 = vrot.slane %v55_v30, 2  ;;  %v46_v43 = vmax.f32 %v44_v34, 0.0  ;;  %s151_s5 = sshll.u32 %s201_s1, 4  ;;  %s152_s5 = int_to_ptr.vmem [resolvable:$true] %s151_s5 }
  0x9c   :  { %v53_v38 = vadd.f32 %v52_v32, %v51_v27  ;;  %v64_v39 = vrot.slane %v63_v33, 1  ;;  %v68_v41 = vrot.slane %v67_v37, 2  ;;  %v45_v45 = vmul.f32 0.003921569, %v43_v36  ;;  %v94_v32 = vld [vmem:[%s302_s2 + $0x8] sm:$0xff]  ;;  %p181_p1 = scmp.lt.s32.totalorder %s152_s5, %s152_s5 }
  0x9d   :  { %v57_v40 = vadd.f32 %v56_v35, %v55_v30  ;;  %v82_v52 = vadd.f32 1e-05, %v46_v43 }
  0x9e   :  { %v72_v42 = vmul.f32 0.0009765625, %v53_v38  ;;  %v69_v46 = vadd.f32 %v68_v41, %v67_v37  ;;  %v65_v47 = vadd.f32 %v64_v39, %v63_v33  ;;  %v47_v54 = vmax.f32 %v45_v45, 0.0 }
  0x9f   :  { %v58_v44 = vrot.slane %v57_v40, 1  ;;  %168 = vrsqrt.f32 %v82_v52 }
  0xa0   :  { %v74_v48 = vmul.f32 %v72_v42, %v53_v38  ;;  %v70_v50 = vrot.slane %v69_v46, 1  ;;  %v83_v60 = vadd.f32 1e-05, %v47_v54 }
  0xa1   :  { %v59_v49 = vadd.f32 %v58_v44, %v57_v40 }
  0xa2   :  { %v76_v51 = vsub.f32 %v65_v47, %v74_v48  ;;  %v71_v56 = vadd.f32 %v70_v50, %v69_v46 }
  0xa3   :  { %v73_v53 = vmul.f32 0.0009765625, %v59_v49 }
  0xa4   :  { %v78_v55 = vmul.f32 0.0009775171, %v76_v51 }
  0xa5   :  { %v75_v57 = vmul.f32 %v73_v53, %v59_v49 }
  0xa6   :  { %v80_v58 = vmax.f32 %v78_v55, 0.0 }
  0xa7   :  { %v77_v59 = vsub.f32 %v71_v56, %v75_v57 }
  0xa8   :  { %v86_v61 = vadd.f32 1e-05, %v80_v58 }
  0xa9   :  { %v79_v62 = vmul.f32 0.0009775171, %v77_v59  ;;  %v169_v5 = vpop.eup %168 }
  0xaa   :  { %170 = vrsqrt.f32 %v86_v61  ;;  %v95_v9 = vmul.f32 %v169_v5, %v90_v4 }
  0xab   :  { %v81_v63 = vmax.f32 %v79_v62, 0.0  ;;  %172 = vrsqrt.f32 %v83_v60 }
  0xac   :  { %v104_v17 = vmul.f32 %v95_v9, %v261_v14  ;;  %v93_v14 = vld [vmem:[%s302_s2] sm:$0xff]  ;;  %s176_s2 = scalar_lea.vmem %s152_s5, 512 }
  0xad   :  { %v87_v3 = vadd.f32 1e-05, %v81_v63  ;;  %p177_p0 = scmp.ne.s32.totalorder %s152_s5, %s176_s2  ;;  %p182_p2 = scmp.lt.s32.totalorder %s176_s2, %s176_s2 }
  0xaf   :  { %174 = vrsqrt.f32 %v87_v3  ;;  %p183_p3 = por %p182_p2, %p181_p1 }
  0xb1   :  { %p184_p4 = pnand %p183_p3, %p177_p0 }
  0xb4   :  { %v171_v8 = vpop.eup %170 }
  0xb5   :  { %v173_v10 = vpop.eup %172  ;;  %v98_v11 = vmul.f32 %v171_v8, %v97_v7 }
  0xb6   :  { %v96_v16 = vmul.f32 %v173_v10, %v90_v4 }
  0xb7   :  { %v100_v13 = vadd.f32 %v98_v11, %v95_v9  ;;  %v106_v15 = vmul.f32 %v98_v11, %v72_v42 }
  0xb8   :  { %v105_v25 = vmul.f32 %v96_v16, %v264_v23 }
  0xb9   :  { %v175_v18 = vpop.eup %174  ;;  %v102_v19 = vmul.f32 %v100_v13, %v91_v12  ;;  %v108_v21 = vadd.f32 %v106_v15, %v104_v17 }
  0xba   :  { %v99_v20 = vmul.f32 %v175_v18, %v97_v7 }
  0xbb   :  { %116 = vperm.xlu0 %166, %v102_v19   ;;  %v110_v28 = vmul.f32 %v108_v21, %v91_v12 }
  0xbc   :  { %v101_v24 = vadd.f32 %v99_v20, %v96_v16  ;;  %v107_v26 = vmul.f32 %v99_v20, %v73_v53 }
  0xbd   :  { %v112_v30 = vsub.f32 %v93_v14, %v110_v28 }
  0xbe   :  { %v103_v27 = vmul.f32 %v101_v24, %v92_v22  ;;  %v109_v29 = vadd.f32 %v107_v26, %v105_v25 }
  0xc0   :  { %121 = vperm.xlu1 %167, %v103_v27   ;;  %v111_v31 = vmul.f32 %v109_v29, %v92_v22 }
  0xc2   :  { %v113_v33 = vsub.f32 %v94_v32, %v111_v31 }
  0xc4   :  { %130 = vperm.xlu1 %167, %v112_v30  }
  0xc8   :  { %135 = vperm.xlu1 %167, %v113_v33  }
 0x13a   :  { %v117_v34 = vpop.permute.xlu0 %116 }
 0x13b   :  { %v124_v35 = vmul.f32 %v117_v34, %v232_v0  ;;  %v125_v36 = vmul.f32 %v117_v34, %v237_v1 }
 0x13f   :  { %v122_v23 = vpop.permute.xlu1 %121 }
 0x140   :  { %v126_v40 = vmul.f32 %v122_v23, %v242_v2  ;;  %v127_v41 = vmul.f32 %v122_v23, %v253_v6 }
 0x143   :  { %v131_v37 = vpop.permute.xlu1 %130 }
 0x144   :  { %v138_v38 = vadd.f32 %v131_v37, %v124_v35  ;;  %v139_v39 = vadd.f32 %v131_v37, %v125_v36 }
 0x146   :  { %142 = vst [vmem:[#allocation2] sm:$0xff] %v138_v38  ;;  %143 = vst [vmem:[#allocation2 + $0x8] sm:$0xff] %v139_v39 }
 0x147   :  { %v136_v42 = vpop.permute.xlu1 %135 }
 0x148   :  { %v140_v43 = vadd.f32 %v136_v42, %v126_v40  ;;  %v141_v44 = vadd.f32 %v136_v42, %v127_v41 }
 0x14a   :  { %144 = vst [vmem:[#allocation2 + $0x10] sm:$0xff] %v140_v43  ;;  %145 = vst [vmem:[#allocation2 + $0x18] sm:$0xff] %v141_v44 }
 0x14b   :  { %187 = shalt.err (!%p184_p4)
}
 0x14c   :  { %s188_s8 = scalar_lea.hbm %s304_s4, 512 }
 0x14d   :  { %p189_p5 = scmp.ne.s32.totalorder %s304_s4, %s188_s8  ;;  %p192_p6 = scmp.lt.u32.totalorder %s188_s8, %s304_s4 }
 0x14f   :  { %p194_p7 = pnand %p192_p6, %p189_p5 }
 0x151   :  { %197 = shalt.err (!%p194_p7)
}
 0x152   :  { %s202_s13 = smov 256   ;;  %s203_s14 = smov 16  }
 0x153   :  { %157 = dma.vmem_to_hbm [thread:$0]  %s152_s5, 512, %s304_s4, [#allocation3], %s202_s13, %s202_s13, %s203_s14  }
 0x154   :  { %198 = dma.done.wait [#allocation3], 512  }
 0x155   :  { %199 = vsyncadd [#allocation3], 4294966784 }
 0x156   :  { %161 = vsyncpa [#allocation3], 1 }

</bundles_post_ra>
